<compile_context>
chip_gen: v6e
topology: v6e:2x2x1
jax: 0.10.0
libtpu: 0.0.40
codegen_flags: <defaults>
</compile_context>

<pallas_src>
import jax
import jax.numpy as jnp
from jax.experimental import pallas as pl
from jax.experimental.pallas import tpu as pltpu


# ---------------------------------------------------------------------------
# Helpers
# ---------------------------------------------------------------------------
def _round_up(x, m):
    return (x + m - 1) // m * m


def _pick_vmem_limit_bytes():
    # ~3/4 of physical VMEM, capped at 100 MiB.
    # v5e/v6e: 128 MiB/TC -> 96/100 MiB; v7x: 64 MiB/TC -> 48 MiB.
    try:
        cap = pltpu.get_tpu_info().vmem_capacity_bytes
        return int(min(cap * 3 // 4, 100 << 20))
    except Exception:
        return 48 << 20  # safe on every generation


# ---------------------------------------------------------------------------
# Pallas kernel: fused FFN  y = gelu(x @ W1 + b1) @ W2 + b2
# ---------------------------------------------------------------------------
def _ffn_kernel(x_ref, w1_ref, b1_ref, w2_ref, b2_ref, o_ref, acc_ref):
    """One (m-tile i, f-tile k) grid step."""
    k = pl.program_id(1)

    @pl.when(k == 0)
    def _init():
        acc_ref[...] = jnp.zeros_like(acc_ref)

    # MXU matmuls: bf16 operands, f32 accumulation.
    x = x_ref[...].astype(jnp.bfloat16)                          # [TM, H]
    h = jnp.dot(x, w1_ref[...],
                preferred_element_type=jnp.float32)              # [TM, TF]
    # Bias-add + GeLU in f32 (VPU/EUP), f32-safe on v5e as well.
    h = jax.nn.gelu(h + b1_ref[...], approximate=True)
    acc_ref[...] += jnp.dot(h.astype(jnp.bfloat16), w2_ref[...],
                            preferred_element_type=jnp.float32)  # [TM, H]

    @pl.when(k == pl.num_programs(1) - 1)
    def _finalize():
        o_ref[...] = (acc_ref[...] + b2_ref[...]).astype(o_ref.dtype)


def ffn_forward(x2d, w1, b1, w2, b2, *, tm=512, tf=512):
    """x2d: [M, H] f32; w1: [H, F] bf16; b1: [1, F] f32;
    w2: [F, H] bf16; b2: [1, H] f32.  Returns [M, H] f32."""
    M, H = x2d.shape
    F = w1.shape[1]

    # Row tile: multiple of 8 sublanes; pad M so the grid divides evenly.
    tm_eff = min(tm, _round_up(M, 8))
    m_pad = _round_up(M, tm_eff)
    if m_pad != M:
        x2d = jnp.pad(x2d, ((0, m_pad - M), (0, 0)))

    # F tile (intermediate width / second-matmul contraction): must divide F.
    tf_eff = min(tf, F)
    if F % tf_eff != 0:
        tf_eff = F

    grid = (m_pad // tm_eff, F // tf_eff)

    cost = pl.CostEstimate(
        flops=4 * M * H * F,                       # two matmuls
        transcendentals=M * F,                     # tanh-gelu
        bytes_accessed=(M * H * 4                  # x (f32)
                        + H * F * 2 + F * H * 2    # w1, w2 (bf16)
                        + F * 4 + H * 4            # biases (f32)
                        + M * H * 4),              # output (f32)
    )

    out = pl.pallas_call(
        _ffn_kernel,
        out_shape=jax.ShapeDtypeStruct((m_pad, H), x2d.dtype),
        grid_spec=pltpu.PrefetchScalarGridSpec(
            num_scalar_prefetch=0,
            grid=grid,
            in_specs=[
                pl.BlockSpec((tm_eff, H), lambda i, k: (i, 0)),   # x rows
                pl.BlockSpec((H, tf_eff), lambda i, k: (0, k)),   # W1 panel
                pl.BlockSpec((1, tf_eff), lambda i, k: (0, k)),   # b1 slice
                pl.BlockSpec((tf_eff, H), lambda i, k: (k, 0)),   # W2 panel
                pl.BlockSpec((1, H),      lambda i, k: (0, 0)),   # b2 resident
            ],
            out_specs=pl.BlockSpec((tm_eff, H), lambda i, k: (i, 0)),
            scratch_shapes=[pltpu.VMEM((tm_eff, H), jnp.float32)],
        ),
        compiler_params=pltpu.CompilerParams(
            dimension_semantics=("parallel", "arbitrary"),
            vmem_limit_bytes=_pick_vmem_limit_bytes(),
        ),
        cost_estimate=cost,
    )(x2d, w1, b1, w2, b2)

    return out[:M] if m_pad != M else out


# ---------------------------------------------------------------------------
# Wrapped module (the `module` handed to DistributedGroupedDataParallel)
# ---------------------------------------------------------------------------
class ExpertFFN:
    """FastMoE-style expert: Linear(H,F) -> GeLU -> Linear(F,H)."""

    def __init__(self, hidden, ffn, key, *, tm=512, tf=512):
        k1, k2, k3, k4 = jax.random.split(key, 4)
        # Weights stored bf16 (MXU operands), biases f32.
        self.w1 = (jax.random.normal(k1, (hidden, ffn), jnp.float32)
                   * (1.0 / jnp.sqrt(hidden))).astype(jnp.bfloat16)
        self.b1 = 0.01 * jax.random.normal(k3, (1, ffn), jnp.float32)
        self.w2 = (jax.random.normal(k2, (ffn, hidden), jnp.float32)
                   * (1.0 / jnp.sqrt(ffn))).astype(jnp.bfloat16)
        self.b2 = 0.01 * jax.random.normal(k4, (1, hidden), jnp.float32)
        self.tm, self.tf = tm, tf
        # dp_comm tags, mirroring fmoe convention
        self.dp_comm = {'w1': 'dp', 'b1': 'dp', 'w2': 'dp', 'b2': 'dp'}

    def parameters(self):
        return {'w1': self.w1, 'b1': self.b1, 'w2': self.w2, 'b2': self.b2}

    def __call__(self, x):
        # x: [B, S, H] (contiguous, H on the lane axis) -> [B, S, H]
        B, S, H = x.shape
        y2d = ffn_forward(x.reshape(B * S, H), self.w1, self.b1,
                          self.w2, self.b2, tm=self.tm, tf=self.tf)
        return y2d.reshape(B, S, H)


# ---------------------------------------------------------------------------
# DistributedGroupedDataParallel (JAX version)
# ---------------------------------------------------------------------------
class DistributedGroupedDataParallel:
    """Forward is a direct pass-through to the wrapped module."""

    def __init__(self, module, mp_group=None, dp_group=None, moe_group=None,
                 world_group=None, auto_allreduce=False):
        assert not auto_allreduce, 'Automatic all-reduce is not implemented yet'
        self.module = module
        self.comms = {'mp': mp_group, 'dp': dp_group,
                      'moe': moe_group, 'world': world_group}
        self._sync_params()

    def _sync_params(self):
        # TODO(synk): torch.distributed.broadcast across process groups is a
        # multi-host collective; with world size 1 this is an identity copy.
        _ = {name: p for name, p in self.module.parameters().items()}

    def allreduce_params(self, no_scale=False, reduce_after=False,
                         fp32_allreduce=False):
        # TODO(synk): grad all-reduce over dp/moe/world groups belongs to the
        # backward/optimizer path, not the forward pass.
        pass

    def __call__(self, *args, **kwargs):
        return self.module(*args, **kwargs)


# ---------------------------------------------------------------------------
# Reference (pure JAX, same bf16-operand / f32-accumulate math)
# ---------------------------------------------------------------------------
def _ref_forward(x, w1, b1, w2, b2):
    B, S, H = x.shape
    x2 = x.reshape(B * S, H).astype(jnp.bfloat16)
    h = jnp.dot(x2, w1, preferred_element_type=jnp.float32) + b1
    h = jax.nn.gelu(h, approximate=True)
    y = jnp.dot(h.astype(jnp.bfloat16), w2,
                preferred_element_type=jnp.float32) + b2
    return y.reshape(B, S, H)


if __name__ == "__main__":
    key = jax.random.PRNGKey(0)
    k_mod, k_x = jax.random.split(key)

    # Small but lane-aligned shapes: H, F multiples of 128; tiles chosen so
    # both grid axes have >1 step (exercises pipelining + accumulation).
    B, S, H, F = 2, 128, 128, 256
    expert = ExpertFFN(H, F, k_mod, tm=128, tf=128)
    ddp = DistributedGroupedDataParallel(expert)

    x = jax.random.normal(k_x, (B, S, H), jnp.float32)

    y = ddp(x)
    y = jax.block_until_ready(y)

    y_ref = _ref_forward(x, expert.w1, expert.b1, expert.w2, expert.b2)
    assert y.shape == (B, S, H)
    assert jnp.allclose(y, y_ref, atol=2e-2, rtol=2e-2), "mismatch vs reference"

    print("KERNEL_OK")
</pallas_src>

<mosaic_0001>
module attributes {stable_mosaic.version = 11 : i64} {
  func.func @_ffn_kernel(%arg0: i32, %arg1: i32, %arg2: memref<128x128xf32, #tpu.memory_space<vmem>>, %arg3: memref<128x128xbf16, #tpu.memory_space<vmem>>, %arg4: memref<1x128xf32, #tpu.memory_space<vmem>>, %arg5: memref<128x128xbf16, #tpu.memory_space<vmem>>, %arg6: memref<1x128xf32, #tpu.memory_space<vmem>>, %arg7: memref<128x128xf32, #tpu.memory_space<vmem>>, %arg8: memref<128x128xf32, #tpu.memory_space<vmem>>) attributes {dimension_semantics = [#tpu.dimension_semantics<parallel>, #tpu.dimension_semantics<arbitrary>], iteration_bounds = array<i64: 2, 2>, scalar_prefetch = 0 : i64, scratch_operands = 1 : i64, tpu.core_type = #tpu.core_type<tc>, window_params = [{transform_indices = @transform_0, window_bounds = array<i64: 128, 128>}, {transform_indices = @transform_1, window_bounds = array<i64: 128, 128>}, {transform_indices = @transform_2, window_bounds = array<i64: 1, 128>}, {transform_indices = @transform_3, window_bounds = array<i64: 128, 128>}, {pipeline_mode = #tpu.pipeline_mode<synchronous>, transform_indices = @transform_4, window_bounds = array<i64: 1, 128>}, {transform_indices = @transform_5, window_bounds = array<i64: 128, 128>}]} {
    %c0_i32 = arith.constant 0 : i32
    %0 = arith.cmpi eq, %arg1, %c0_i32 : i32
    %1 = arith.extui %0 : i1 to i32
    %c0_i32_0 = arith.constant 0 : i32
    %2 = arith.cmpi ne, %1, %c0_i32_0 : i32
    scf.if %2 {
      %cst_18 = arith.constant 0.000000e+00 : f32
      %32 = vector.broadcast %cst_18 : f32 to vector<128x128xf32>
      %c0_19 = arith.constant 0 : index
      %c0_20 = arith.constant 0 : index
      %33 = vector.load %arg8[%c0_19, %c0_20] : memref<128x128xf32, #tpu.memory_space<vmem>>, vector<128x128xf32>
      tpu.vector_store %arg8[%c0_19, %c0_20], %32 {strides = array<i32>} : memref<128x128xf32, #tpu.memory_space<vmem>>, vector<128x128xf32>,
    } else {
    }
    %c0 = arith.constant 0 : index
    %c0_1 = arith.constant 0 : index
    %3 = vector.load %arg2[%c0, %c0_1] : memref<128x128xf32, #tpu.memory_space<vmem>>, vector<128x128xf32>
    %4 = arith.truncf %3 : vector<128x128xf32> to vector<128x128xbf16>
    %c0_2 = arith.constant 0 : index
    %c0_3 = arith.constant 0 : index
    %5 = vector.load %arg3[%c0_2, %c0_3] : memref<128x128xbf16, #tpu.memory_space<vmem>>, vector<128x128xbf16>
    %cst = arith.constant dense<0.000000e+00> : vector<128x128xf32>
    %6 = tpu.matmul %4, %5, %cst {dimension_numbers = #tpu.dot_dimension_numbers<[1], [0], [0], [1], [0, 0, 1, 1], [], []>} : vector<128x128xbf16>, vector<128x128xbf16>, vector<128x128xf32> -> vector<128x128xf32>
    %c0_4 = arith.constant 0 : index
    %c0_5 = arith.constant 0 : index
    %7 = vector.load %arg4[%c0_4, %c0_5] : memref<1x128xf32, #tpu.memory_space<vmem>>, vector<1x128xf32>
    %8 = vector.broadcast %7 : vector<1x128xf32> to vector<128x128xf32>
    %9 = arith.addf %6, %8 : vector<128x128xf32>
    %10 = arith.mulf %9, %9 : vector<128x128xf32>
    %11 = arith.mulf %9, %10 : vector<128x128xf32>
    %cst_6 = arith.constant 4.471500e-02 : f32
    %12 = vector.broadcast %cst_6 : f32 to vector<128x128xf32>
    %13 = arith.mulf %12, %11 : vector<128x128xf32>
    %14 = arith.addf %9, %13 : vector<128x128xf32>
    %cst_7 = arith.constant 0.797884583 : f32
    %15 = vector.broadcast %cst_7 : f32 to vector<128x128xf32>
    %16 = arith.mulf %15, %14 : vector<128x128xf32>
    %17 = math.tanh %16 : vector<128x128xf32>
    %cst_8 = arith.constant 1.000000e+00 : f32
    %18 = vector.broadcast %cst_8 : f32 to vector<128x128xf32>
    %19 = arith.addf %18, %17 : vector<128x128xf32>
    %cst_9 = arith.constant 5.000000e-01 : f32
    %20 = vector.broadcast %cst_9 : f32 to vector<128x128xf32>
    %21 = arith.mulf %20, %19 : vector<128x128xf32>
    %22 = arith.mulf %9, %21 : vector<128x128xf32>
    %c0_10 = arith.constant 0 : index
    %c0_11 = arith.constant 0 : index
    %23 = vector.load %arg8[%c0_10, %c0_11] : memref<128x128xf32, #tpu.memory_space<vmem>>, vector<128x128xf32>
    %24 = arith.truncf %22 : vector<128x128xf32> to vector<128x128xbf16>
    %c0_12 = arith.constant 0 : index
    %c0_13 = arith.constant 0 : index
    %25 = vector.load %arg5[%c0_12, %c0_13] : memref<128x128xbf16, #tpu.memory_space<vmem>>, vector<128x128xbf16>
    %cst_14 = arith.constant dense<0.000000e+00> : vector<128x128xf32>
    %26 = tpu.matmul %24, %25, %cst_14 {dimension_numbers = #tpu.dot_dimension_numbers<[1], [0], [0], [1], [0, 0, 1, 1], [], []>} : vector<128x128xbf16>, vector<128x128xbf16>, vector<128x128xf32> -> vector<128x128xf32>
    %27 = arith.addf %23, %26 : vector<128x128xf32>
    %c0_15 = arith.constant 0 : index
    %c0_16 = arith.constant 0 : index
    %28 = vector.load %arg8[%c0_15, %c0_16] : memref<128x128xf32, #tpu.memory_space<vmem>>, vector<128x128xf32>
    tpu.vector_store %arg8[%c0_15, %c0_16], %27 {strides = array<i32>} : memref<128x128xf32, #tpu.memory_space<vmem>>, vector<128x128xf32>,
    %c1_i32 = arith.constant 1 : i32
    %29 = arith.cmpi eq, %arg1, %c1_i32 : i32
    %30 = arith.extui %29 : i1 to i32
    %c0_i32_17 = arith.constant 0 : i32
    %31 = arith.cmpi ne, %30, %c0_i32_17 : i32
    scf.if %31 {
      %c0_18 = arith.constant 0 : index
      %c0_19 = arith.constant 0 : index
      %32 = vector.load %arg8[%c0_18, %c0_19] : memref<128x128xf32, #tpu.memory_space<vmem>>, vector<128x128xf32>
      %c0_20 = arith.constant 0 : index
      %c0_21 = arith.constant 0 : index
      %33 = vector.load %arg6[%c0_20, %c0_21] : memref<1x128xf32, #tpu.memory_space<vmem>>, vector<1x128xf32>
      %34 = vector.broadcast %33 : vector<1x128xf32> to vector<128x128xf32>
      %35 = arith.addf %32, %34 : vector<128x128xf32>
      %c0_22 = arith.constant 0 : index
      %c0_23 = arith.constant 0 : index
      %36 = vector.load %arg7[%c0_22, %c0_23] : memref<128x128xf32, #tpu.memory_space<vmem>>, vector<128x128xf32>
      tpu.vector_store %arg7[%c0_22, %c0_23], %35 {strides = array<i32>} : memref<128x128xf32, #tpu.memory_space<vmem>>, vector<128x128xf32>,
    } else {
    }
    return
  }
  func.func @transform_0(%arg0: i32, %arg1: i32) -> (i32, i32) {
    %c0_i32 = arith.constant 0 : i32
    %c0_i32_0 = arith.constant 0 : i32
    return %arg0, %c0_i32 : i32, i32
  }
  func.func @transform_1(%arg0: i32, %arg1: i32) -> (i32, i32) {
    %c0_i32 = arith.constant 0 : i32
    %c0_i32_0 = arith.constant 0 : i32
    return %c0_i32, %arg1 : i32, i32
  }
  func.func @transform_2(%arg0: i32, %arg1: i32) -> (i32, i32) {
    %c0_i32 = arith.constant 0 : i32
    %c0_i32_0 = arith.constant 0 : i32
    return %c0_i32, %arg1 : i32, i32
  }
  func.func @transform_3(%arg0: i32, %arg1: i32) -> (i32, i32) {
    %c0_i32 = arith.constant 0 : i32
    %c0_i32_0 = arith.constant 0 : i32
    return %arg1, %c0_i32 : i32, i32
  }
  func.func @transform_4(%arg0: i32, %arg1: i32) -> (i32, i32) {
    %c0_i32 = arith.constant 0 : i32
    %c0_i32_0 = arith.constant 0 : i32
    %c0_i32_1 = arith.constant 0 : i32
    return %c0_i32, %c0_i32_0 : i32, i32
  }
  func.func @transform_5(%arg0: i32, %arg1: i32) -> (i32, i32) {
    %c0_i32 = arith.constant 0 : i32
    %c0_i32_0 = arith.constant 0 : i32
    return %arg0, %c0_i32 : i32, i32
  }
}

</mosaic_0001>

<bundles_post_ra>
// kernel: tpu_custom_call.1
= control target key start
LH: loop header
LB: loop body
LE: loop exit
PB: predicated region body
PF: predicated region fallthrough
CT: control target
= control target key end

     0   :  { %s2186_s0 = inlined_call_operand.hbm [shape: f32[256,128], index: 0, kind: input, shape index: {}]   ;;  %s2187_s1 = inlined_call_operand.hbm [shape: bf16[128,256], index: 1, kind: input, shape index: {}]   ;;  %s2188_s2 = inlined_call_operand.vmem [shape: f32[1,256], index: 2, kind: input, shape index: {}]   ;;  %s2189_s3 = inlined_call_operand.hbm [shape: bf16[256,128], index: 3, kind: input, shape index: {}]   ;;  %s2190_s4 = inlined_call_operand.vmem [shape: f32[1,128], index: 4, kind: input, shape index: {}]   ;;  %s2191_s5 = inlined_call_operand.hbm [shape: f32[256,128], index: 5, kind: output, shape index: {}]  }
   0x1   :  { %2205 = sst [smem:[#allocation22_spill]] %s2186_s0 }
   0x2   :  { %2206 = sst [smem:[#allocation23_spill]] %s2187_s1 }
   0x3   :  { %2207 = sst [smem:[#allocation24_spill]] %s2190_s4 }
   0x4   :  { %2208 = sst [smem:[#allocation25_spill]] %s2191_s5 }
   0x5   :  { %10 = vsyncpa [#allocation4], 0 }
   0x6   :  { %12 = vsyncpa [#allocation4 + $0x1], 0 }
   0x7   :  { %13 = vsyncpa [#allocation7], 0 }
   0x8   :  { %15 = vsyncpa [#allocation7 + $0x1], 0 }
   0x9   :  { %16 = vsyncpa [#allocation5], 0 }
   0xa   :  { %18 = vsyncpa [#allocation5 + $0x1], 0  ;;  %s1690_s18 = smov 0   ;;  %s1692_s19 = smov 0  }
   0xb   :  { %s1694_s20 = smov 0   ;;  %s1696_s21 = smov 0  }
   0xc   :  { %s1698_s22 = smov 0   ;;  %s1700_s23 = smov 0  }
   0xd   :  { %s1702_s24 = smov 0   ;;  %s1704_s25 = smov 0  }
   0xe   :  { %s1706_s26 = smov 0   ;;  %s1708_s27 = smov 0  }
   0xf   :  { %s1710_s28 = smov 0  }
  0x10 LB: > { %2209 = sst [smem:[#allocation13_spill]] %s1615_s20  ;;  %s33_s29 = sadd.s32 1, %s1639_s26  ;;  %s1647_s28 = sphi %s1710_s28, %s24_s28   ;;  %s1643_s27 = sphi %s1708_s27, %s2246_s27   ;;  %s1639_s26 = sphi %s1706_s26, %s2252_s26   ;;  %s1635_s25 = sphi %s1704_s25, %s2244_s25   ;;  %s1631_s24 = sphi %s1702_s24, %s2251_s24   ;;  %s1627_s23 = sphi %s1700_s23, %s2243_s23   ;;  %s1623_s22 = sphi %s1698_s22, %s2250_s22   ;;  %s1619_s21 = sphi %s1696_s21, %s2249_s21   ;;  %s1615_s20 = sphi %s1694_s20, %s2241_s20   ;;  %s1611_s19 = sphi %s1692_s19, %s2248_s19   ;;  %s1607_s18 = sphi %s1690_s18, %s2247_s18  }
  0x11   : > { %2210 = sst [smem:[#allocation14_spill]] %s1627_s23  ;;  %p51_p0 = scmp.eq.s32.totalorder %s1647_s28, 0 }
  0x12   : > { %2211 = sst [smem:[#allocation15_spill]] %s1635_s25  ;;  %p1747_p1 = scmp.ge.s32.totalorder %s33_s29, 2 }
  0x13   : > { %2212 = sst [smem:[#allocation16_spill]] %s1643_s27  ;;  %s69_s6 = sadd.s32 1, %s1615_s20 }
  0x14   : > { %p76_p2 = scmp.ne.s32.totalorder %s1615_s20, %s1611_s19  ;;  %p82_p3 = scmp.ne.s32.totalorder %s1611_s19, %s1607_s18 }
  0x15   : > { %s2254_s29 = smov (%p1747_p1, %s33_s29), 0  ;;  %p2197_p5 = scmp.lt.s32.totalorder %s1647_s28, 4 }
  0x16   : > { %2214 = sst [smem:[#allocation17_spill]] %s2254_s29  ;;  %p1762_p4 = por %p76_p2, %p51_p0 }
  0x17   : > { %s66_s8 = ssub.s32 %s1639_s26, %s2254_s29  ;;  %s229_s9 = sand.u32 1, %s1647_s28  }
  0x18   : > { %p67_p6 = scmp.eq.s32.totalorder %s66_s8, 0  ;;  %s231_s10 = sand.u32 1, %s1615_s20  }
  0x19   : > { %s1774_s12 = sshll.u32 %s231_s10, 6  ;;  %s1139_s13 = sshll.u32 %s1639_s26, 6 }
  0x1a   : > { %s1772_s11 = scalar_select %p67_p6, %s1615_s20, %s69_s6  }
  0x1b   : > { %s2217_s1 = sld [smem:[#allocation23_spill]]  ;;  %s233_s17 = scalar_lea.vmem [#allocation6], %s1774_s12 }
  0x1c   : > { %2216 = sst [smem:[#allocation18_spill]] %s1772_s11  ;;  %s239_s5 = sshll.u32 %s233_s17, 4  ;;  %s240_s5 = int_to_ptr.vmem [resolvable:$true] %s239_s5 }
  0x1d   : > { %p1785_p7 = pnand %p2197_p5, %p1762_p4  ;;  %p1143_p8 = scmp.ge.s32.totalorder %s1647_s28, 1 }
  0x1e   : > { %s1790_s6 = scalar_lea.sflag [#allocation7], %s229_s9  ;;  %s1452_s8 = scalar_lea.vmem %s240_s5, 1024 }
  0x1f   : > { %p2196_p9 = pneg %p1785_p7  ;;  %p1453_p10 = scmp.ne.s32.totalorder %s240_s5, %s1452_s8 }
  0x20   : > { %s1649_s10 = smov [#allocation6]  }
  0x21   : > { %s238_s16 = scalar_lea.hbm %s2217_s1, %s1139_s13  ;;  %p1455_p11 = pnand %p1453_p10, %p2196_p9 }
  0x22   : > { %s1457_s7 = sshll.u32 %s1649_s10, 4  ;;  %s1458_s7 = int_to_ptr.vmem [resolvable:$false] %s1457_s7 }
  0x23   : > { %p1456_p12 = pneg %p1455_p11  ;;  %s1459_s13 = scalar_lea.vmem %s1458_s7, 2048 }
  0x24   : > { %p1460_p13 = scmp.lt.s32.totalorder %s240_s5, %s1458_s7  ;;  %p1461_p2 = scmp.lt.s32.totalorder %s1459_s13, %s1452_s8 }
  0x26   : > { %p1462_p4 = por %p1461_p2, %p1460_p13 }
  0x28   : > { %p1463_p6 = pnand %p1462_p4, %p1456_p12 }
  0x2a   : > { %1466 = shalt.err (!%p1463_p6)
}
  0x2b   : > { %s2198_s14 = smov 128   ;;  %s2194_s9 = smov 64  }
  0x2c   : > { %s2195_s15 = smov 4   ;;  %p274_p10 = scmp.lt.s32.totalorder %s1647_s28, 5 }
  0x2d   : > { %1286 = dma.hbm_to_vmem [thread:$0]  (!%p1785_p7), %s238_s16, 1024, %s240_s5, %s1790_s6, %s2198_s14, %s2194_s9, %s2195_s15  }
  0x2e   : > { %p1806_p11 = pnand %p1143_p8, %p274_p10  ;;  %s1811_s8 = sadd.s32 4294967295, %s1647_s28  }
  0x2f   : > { %s1132_s10 = sadd.s32 4294967294, %s1647_s28   ;;  %s36_s7 = sadd.s32 1, %s1643_s27 }
  0x30   : > { %s43_s13 = sadd.s32 1, %s1627_s23  ;;  %s2256_s7 = smov (!%p1747_p1, %s36_s7), %s1643_s27 }
  0x31   : > { %p50_p12 = scmp.ne.s32.totalorder %s1627_s23, %s1623_s22  ;;  %p56_p13 = scmp.ne.s32.totalorder %s1623_s22, %s1619_s21 }
  0x32   : > { %p38_p8 = scmp.ge.s32.totalorder %s2256_s7, 2  ;;  %p57_p2 = scmp.eq.s32.totalorder %s1811_s8, 0 }
  0x33   : > { %p1826_p4 = por %p51_p0, %p50_p12  ;;  %p179_p6 = scmp.eq.s32.totalorder %s1811_s8, 3 }
  0x34   : > { %s2258_s7 = smov (%p38_p8, %s2256_s7), 0  ;;  %p1836_p1 = por %p57_p2, %p56_p13 }
  0x35   : > { %2221 = sst [smem:[#allocation19_spill]] %s2258_s7  ;;  %p1843_p10 = por %p82_p3, %p57_p2 }
  0x36   : > { %s40_s9 = ssub.s32 %s1643_s27, %s2258_s7  ;;  %p1849_p0 = por %p179_p6, %p50_p12 }
  0x37   : > { %p41_p9 = scmp.eq.s32.totalorder %s40_s9, 0  ;;  %p185_p5 = scmp.eq.s32.totalorder %s1132_s10, 3 }
  0x38   : > { %s2224_s15 = scalar_select %p1849_p0, 1, 0 }
  0x39   : > { %s208_s14 = sand.u32 1, %s1627_s23   ;;  %s1173_s1 = sshll.u32 %s1643_s27, 11 }
  0x3a   : > { %2225 = sst [smem:[#allocation20_spill]] %s2224_s15  ;;  %p1861_p8 = por %p185_p5, %p56_p13 }
  0x3b   : > { %s1856_s11 = scalar_select %p41_p9, %s1627_s23, %s43_s13  }
  0x3c   : > { %s2227_s20 = scalar_select %p1861_p8, 1, 0 }
  0x3d   : > { %2226 = sst [smem:[#allocation21_spill]] %s1856_s11  ;;  %s1135_s18 = sshll.u32 %s208_s14, 7 }
  0x3e   : > { %s2228_s0 = sld [smem:[#allocation22_spill]]  ;;  %p2229_p3 = scmp.lt.s32.totalorder %s1647_s28, 4 }
  0x3f   : > { %s212_s9 = scalar_lea.vmem [#allocation3], %s1135_s18  ;;  %s209_s13 = scalar_lea.sflag [#allocation4], %s208_s14 }
  0x40   : > { %p1872_p12 = pnand %p2229_p3, %p1826_p4  ;;  %s219_s10 = sshll.u32 %s212_s9, 4  ;;  %s220_s10 = int_to_ptr.vmem [resolvable:$true] %s219_s10 }
  0x41   : > { %s1480_s27 = scalar_lea.vmem %s220_s10, 2048  ;;  %s1653_s11 = smov [#allocation3]  }
  0x42   : > { %p1469_p5 = pneg %p1872_p12  ;;  %p1481_p9 = scmp.ne.s32.totalorder %s220_s10, %s1480_s27 }
  0x43   : > { %s1485_s4 = sshll.u32 %s1653_s11, 4  ;;  %s1486_s4 = int_to_ptr.vmem [resolvable:$false] %s1485_s4 }
  0x44   : > { %s218_s7 = scalar_lea.hbm %s2228_s0, %s1173_s1  ;;  %p1483_p13 = pnand %p1481_p9, %p1469_p5 }
  0x45   : > { %s1487_s1 = scalar_lea.vmem %s1486_s4, 4096  ;;  %p1488_p6 = scmp.lt.s32.totalorder %s220_s10, %s1486_s4 }
  0x46   : > { %p1484_p2 = pneg %p1483_p13  ;;  %p1489_p4 = scmp.lt.s32.totalorder %s1487_s1, %s1480_s27 }
  0x48   : > { %p1490_p3 = por %p1489_p4, %p1488_p6 }
  0x4a   : > { %p1491_p8 = pnand %p1490_p3, %p1484_p2 }
  0x4c   : > { %1494 = shalt.err (!%p1491_p8)
}
  0x4d   : > { %s1654_s25 = smov 8   ;;  %s2231_s5 = smov 128  }
  0x4e   : > { %1283 = dma.hbm_to_vmem [thread:$0]  (!%p1872_p12), %s218_s7, 2048, %s220_s10, %s209_s13, %s2231_s5, %s2231_s5, %s1654_s25  }
  0x4f   : > { %s1174_s14 = sshll.u32 %s1639_s26, 10  ;;  %s259_s0 = scalar_lea.vmem [#allocation8], %s1774_s12 }
  0x50   : > { %s265_s11 = scalar_lea.hbm %s2189_s3, %s1174_s14  ;;  %s266_s4 = sshll.u32 %s259_s0, 4  ;;  %s267_s4 = int_to_ptr.vmem [resolvable:$true] %s266_s4 }
  0x51   : > { %s1508_s27 = scalar_lea.vmem %s267_s4, 1024  ;;  %p2232_p8 = pneg %p1785_p7 }
  0x52   : > { %p1509_p5 = scmp.ne.s32.totalorder %s267_s4, %s1508_s27  ;;  %s1655_s15 = smov [#allocation8]  }
  0x53   : > { %s1513_s1 = sshll.u32 %s1655_s15, 4  ;;  %s1514_s1 = int_to_ptr.vmem [resolvable:$false] %s1513_s1 }
  0x54   : > { %p1511_p9 = pnand %p1509_p5, %p2232_p8  ;;  %s1515_s23 = scalar_lea.vmem %s1514_s1, 2048 }
  0x55   : > { %p1516_p2 = scmp.lt.s32.totalorder %s267_s4, %s1514_s1  ;;  %p1517_p12 = scmp.lt.s32.totalorder %s1515_s23, %s1508_s27 }
  0x56   : > { %p1512_p13 = pneg %p1511_p9 }
  0x57   : > { %p1518_p6 = por %p1517_p12, %p1516_p2 }
  0x59   : > { %p1519_p4 = pnand %p1518_p6, %p1512_p13 }
  0x5b   : > { %1522 = shalt.err (!%p1519_p4)
}
  0x5c   : > { %s2233_s12 = smov 4   ;;  %s2234_s0 = smov 64  }
  0x5d   : > { %1289 = dma.hbm_to_vmem [thread:$0]  (!%p1785_p7), %s265_s11, 1024, %s267_s4, %s1790_s6, %s2234_s0, %s2234_s0, %s2233_s12  }
  0x5e   : > { %278 = sbr.rel (%p1806_p11) target bundleno = 651 (0x28b), region = 40  ;;  %s1899_s7 = sand.u32 (!%p1806_p11), 1, %s1623_s22  }
  0x5f   : > { %s1144_s23 = sshll.u32 (!%p1806_p11), %s1899_s7, 7  ;;  %s281_s10 = scalar_lea.sflag (!%p1806_p11), [#allocation4], %s1899_s7 }
  0x60   : > { %s1903_s13 = scalar_lea.vmem (!%p1806_p11), [#allocation3], %s1144_s23 }
  0x63   : > { %1594 = dma.done.wait (%p1836_p1), %s281_s10, 2048  }
  0x64   : > { %1596 = vsyncadd (%p1836_p1), %s281_s10, 4294965248  ;;  %s289_s29 = sand.u32 1, %s1811_s8   ;;  %s291_s6 = sand.u32 1, %s1611_s19  }
  0x65   : > { %s1145_s17 = sshll.u32 %s291_s6, 6  ;;  %s290_s25 = scalar_lea.sflag [#allocation7], %s289_s29 }
  0x66   : > { %s1911_s5 = scalar_lea.vmem [#allocation6], %s1145_s17 }
  0x67   : > { %1598 = dma.done.wait (%p1843_p10), %s290_s25, 2048  }
  0x68   : > { %1600 = vsyncadd (%p1843_p10), %s290_s25, 4294965248  ;;  %p343_p7 = scmp.lt.s32.totalorder %s1631_s24, 1  ;;  %s1925_s9 = scalar_lea.vmem [#allocation8], %s1145_s17 }
  0x69   : > { %s1927_s11 = scalar_lea.vmem [#allocation9], %s1144_s23  ;;  %p1148_p11 = scmp.ne.s32.totalorder %s1631_s24, 0 }
  0x6a   : > { %s1919_s14 = scalar_select %p343_p7, %s1631_s24, 1 }
  0x6b   : > { %352 = sbr.rel (%p1148_p11) target bundleno = 121 (0x79), region = 56 }
  0x6c   : > { %s345_s8 = scalar_lea.vmem %s2188_s2, %s1919_s14 }
  0x70   : > { %v1656_v0 = vmov 0.0  }
  0x71   : > { %353 = vst [vmem:[#allocation2 + $0x30] sm:$0xff] %v1656_v0  ;;  %354 = vst [vmem:[#allocation2] sm:$0xff] %v1656_v0 }
  0x72   : > { %355 = vst [vmem:[#allocation2 + $0x58] sm:$0xff] %v1656_v0  ;;  %356 = vst [vmem:[#allocation2 + $0x18] sm:$0xff] %v1656_v0 }
  0x73   : > { %357 = vst [vmem:[#allocation2 + $0x50] sm:$0xff] %v1656_v0  ;;  %358 = vst [vmem:[#allocation2 + $0x68] sm:$0xff] %v1656_v0 }
  0x74   : > { %359 = vst [vmem:[#allocation2 + $0x8] sm:$0xff] %v1656_v0  ;;  %360 = vst [vmem:[#allocation2 + $0x48] sm:$0xff] %v1656_v0 }
  0x75   : > { %361 = vst [vmem:[#allocation2 + $0x40] sm:$0xff] %v1656_v0  ;;  %362 = vst [vmem:[#allocation2 + $0x20] sm:$0xff] %v1656_v0 }
  0x76   : > { %363 = vst [vmem:[#allocation2 + $0x10] sm:$0xff] %v1656_v0  ;;  %364 = vst [vmem:[#allocation2 + $0x38] sm:$0xff] %v1656_v0 }
  0x77   : > { %365 = vst [vmem:[#allocation2 + $0x60] sm:$0xff] %v1656_v0  ;;  %366 = vst [vmem:[#allocation2 + $0x70] sm:$0xff] %v1656_v0 }
  0x78   : > { %367 = vst [vmem:[#allocation2 + $0x78] sm:$0xff] %v1656_v0  ;;  %368 = vst [vmem:[#allocation2 + $0x28] sm:$0xff] %v1656_v0 }
  0x79 PF: > { %v1391_v1 = vld [vmem:[%s1911_s5 + $0x38] sm:$0xff]   ;;  %v1392_v2 = vld [vmem:[%s1911_s5 + $0x30] sm:$0xff]   ;;  %v1393_v3 = vld [vmem:[%s1911_s5 + $0x28] sm:$0xff]   ;;  %p1166_p1 = scmp.ne.s32.totalorder %s1631_s24, 1 }
  0x7a   : > { %1208 = vmatprep.subr.bf16.mxu0 %v1391_v1  ;;  %v1394_v4 = vld [vmem:[%s1911_s5 + $0x20] sm:$0xff]   ;;  %v370_v6 = vld [vmem:[%s1903_s13 + $0x8] sm:$0xff]  ;;  %v1395_v8 = vld [vmem:[%s1911_s5 + $0x18] sm:$0xff]   ;;  %s2235_s1 = sld [smem:[#allocation24_spill]] (!%p1166_p1) }
  0x7b   : > { %1209 = vmatpush3.bf16.msra.mxu0 %v1391_v1  ;;  %v369_v5 = vld [vmem:[%s1903_s13] sm:$0xff]  ;;  %v1396_v9 = vld [vmem:[%s1911_s5 + $0x10] sm:$0xff]   ;;  %v1397_v10 = vld [vmem:[%s1911_s5 + $0x8] sm:$0xff]  }
  0x7c   : > { %1210 = vmatprep.subr.bf16.mxu0 %v1392_v2  ;;  %v385_v7 = vpack.c.bf16 %v370_v6, %v369_v5  ;;  %v1398_v11 = vld [vmem:[%s1911_s5] sm:$0xff]   ;;  %v371_v12 = vld [vmem:[%s1903_s13 + $0x10] sm:$0xff]  ;;  %v372_v13 = vld [vmem:[%s1903_s13 + $0x18] sm:$0xff] }
  0x7d   : > { %v373_v14 = vld [vmem:[%s1903_s13 + $0x20] sm:$0xff]  ;;  %v374_v15 = vld [vmem:[%s1903_s13 + $0x28] sm:$0xff]  ;;  %v386_v16 = vpack.c.bf16 %v372_v13, %v371_v12  ;;  %v375_v18 = vld [vmem:[%s1903_s13 + $0x30] sm:$0xff] }
  0x7e   : > { %1224 = vmatprep.mubr.bf16.mxu0 %v385_v7  ;;  %v387_v17 = vpack.c.bf16 %v374_v15, %v373_v14  ;;  %v376_v19 = vld [vmem:[%s1903_s13 + $0x38] sm:$0xff]  ;;  %v377_v20 = vld [vmem:[%s1903_s13 + $0x40] sm:$0xff]  ;;  %v378_v21 = vld [vmem:[%s1903_s13 + $0x48] sm:$0xff] }
  0x7f   : > { %1211 = vmatpush3.bf16.msra.mxu0 %v1392_v2  ;;  %v388_v22 = vpack.c.bf16 %v376_v19, %v375_v18  ;;  %v389_v23 = vpack.c.bf16 %v378_v21, %v377_v20  ;;  %v379_v24 = vld [vmem:[%s1903_s13 + $0x50] sm:$0xff]  ;;  %v380_v25 = vld [vmem:[%s1903_s13 + $0x58] sm:$0xff]  ;;  %v381_v26 = vld [vmem:[%s1903_s13 + $0x60] sm:$0xff] }
  0x80   : > { %1212 = vmatprep.subr.bf16.mxu0 %v1393_v3  ;;  %v382_v27 = vld [vmem:[%s1903_s13 + $0x68] sm:$0xff]  ;;  %v390_v28 = vpack.c.bf16 %v380_v25, %v379_v24  ;;  %v383_v30 = vld [vmem:[%s1903_s13 + $0x70] sm:$0xff]  ;;  %v384_v31 = vld [vmem:[%s1903_s13 + $0x78] sm:$0xff] }
  0x81   : > { %v391_v29 = vpack.c.bf16 %v382_v27, %v381_v26  ;;  %v392_v32 = vpack.c.bf16 %v384_v31, %v383_v30  ;;  %v1399_v33 = vld [vmem:[%s1925_s9 + $0x38] sm:$0xff]   ;;  %v1400_v34 = vld [vmem:[%s1925_s9 + $0x30] sm:$0xff]   ;;  %v1401_v35 = vld [vmem:[%s1925_s9 + $0x28] sm:$0xff]  }
  0x82   : > { %1240 = vmatprep.subr.bf16.mxu1 %v1399_v33  ;;  %v1402_v36 = vld [vmem:[%s1925_s9 + $0x20] sm:$0xff]   ;;  %v1403_v37 = vld [vmem:[%s1925_s9 + $0x18] sm:$0xff]   ;;  %v1404_v38 = vld [vmem:[%s1925_s9 + $0x10] sm:$0xff]  }
  0x83   : > { %1213 = vmatpush3.bf16.msra.mxu0 %v1393_v3  ;;  %1241 = vmatpush3.bf16.msra.mxu1 %v1399_v33  ;;  %v1405_v39 = vld [vmem:[%s1925_s9 + $0x8] sm:$0xff]   ;;  %v1406_v40 = vld [vmem:[%s1925_s9] sm:$0xff]  }
  0x84   : > { %1214 = vmatprep.subr.bf16.mxu0 %v1394_v4  ;;  %1242 = vmatprep.subr.bf16.mxu1 %v1400_v34  ;;  %v1967_v41 = vld [vmem:[%s345_s8] ss:$0 sm:$0xff] }
  0x87   : > { %1215 = vmatpush3.bf16.msra.mxu0 %v1394_v4  ;;  %1243 = vmatpush3.bf16.msra.mxu1 %v1400_v34 }
  0x88   : > { %1216 = vmatprep.subr.bf16.mxu0 %v1395_v8  ;;  %1244 = vmatprep.subr.bf16.mxu1 %v1401_v35 }
  0x8b   : > { %1217 = vmatpush3.bf16.msra.mxu0 %v1395_v8  ;;  %1245 = vmatpush3.bf16.msra.mxu1 %v1401_v35 }
  0x8c   : > { %1218 = vmatprep.subr.bf16.mxu0 %v1396_v9  ;;  %1246 = vmatprep.subr.bf16.mxu1 %v1402_v36 }
  0x8f   : > { %1219 = vmatpush3.bf16.msra.mxu0 %v1396_v9  ;;  %1247 = vmatpush3.bf16.msra.mxu1 %v1402_v36 }
  0x90   : > { %1220 = vmatprep.subr.bf16.mxu0 %v1397_v10  ;;  %1248 = vmatprep.subr.bf16.mxu1 %v1403_v37 }
  0x93   : > { %1221 = vmatpush3.bf16.msra.mxu0 %v1397_v10  ;;  %1249 = vmatpush3.bf16.msra.mxu1 %v1403_v37 }
  0x94   : > { %1222 = vmatprep.subr.bf16.mxu0 %v1398_v11  ;;  %1250 = vmatprep.subr.bf16.mxu1 %v1404_v38 }
  0x97   : > { %1223 = vmatpush3.bf16.msra.mxu0 %v1398_v11  ;;  %1251 = vmatpush3.bf16.msra.mxu1 %v1404_v38 }
  0x98   : > { %1252 = vmatprep.subr.bf16.mxu1 %v1405_v39 }
  0x9a   : > { %1225 = vmatmul.mubr.bf16.vlgmr.msra.gmra.mxu0 %v386_v16 }
  0x9b   : > { %1228 = vmatprep.mubr.bf16.mxu0 %v387_v17  ;;  %1253 = vmatpush3.bf16.msra.mxu1 %v1405_v39 }
  0x9c   : > { %1254 = vmatprep.subr.bf16.mxu1 %v1406_v40 }
  0x9f   : > { %1255 = vmatpush3.bf16.msra.mxu1 %v1406_v40 }
  0xa2   : > { %1229 = vmatmul.mubr.bf16.gmra.mxu0 %v388_v22 }
  0xa3   : > { %1232 = vmatprep.mubr.bf16.mxu0 %v389_v23 }
  0xaa   : > { %1233 = vmatmul.mubr.bf16.gmra.mxu0 %v390_v28 }
  0xab   : > { %1236 = vmatprep.mubr.bf16.mxu0 %v391_v29 }
  0xb2   : > { %1237 = vmatmul.mubr.bf16.gmra.mxu0 %v392_v32 }
 0x15a   : > { %v1226_v42 = vpop.f32.mrf.mxu0 }
 0x15b   : > { %v1970_v43 = vadd.f32 %v1226_v42, %v1967_v41 }
 0x15c   : > { %v498_v44 = vpop.f32.mrf.mxu0 }
 0x15d   : > { %v563_v45 = vmul.f32 %v1970_v43, %v1970_v43  ;;  %v1975_v46 = vadd.f32 %v1967_v41, %v498_v44 }
 0x15e   : > { %v1227_v47 = vpop.f32.mrf.mxu0 }
 0x15f   : > { %v579_v48 = vmul.f32 %v563_v45, %v1970_v43  ;;  %v561_v49 = vmul.f32 %v1975_v46, %v1975_v46  ;;  %v1981_v50 = vadd.f32 %v1227_v47, %v1967_v41 }
 0x160   : > { %v501_v51 = vpop.f32.mrf.mxu0 }
 0x161   : > { %v595_v52 = vmul.f32 0.044715, %v579_v48  ;;  %v577_v53 = vmul.f32 %v561_v49, %v1975_v46  ;;  %v564_v54 = vmul.f32 %v1981_v50, %v1981_v50  ;;  %v1987_v55 = vadd.f32 %v1967_v41, %v501_v51 }
 0x162   : > { %v1230_v56 = vpop.f32.mrf.mxu0 }
 0x163   : > { %v611_v57 = vadd.f32 %v595_v52, %v1970_v43  ;;  %v593_v58 = vmul.f32 0.044715, %v577_v53  ;;  %v580_v59 = vmul.f32 %v564_v54, %v1981_v50  ;;  %v562_v60 = vmul.f32 %v1987_v55, %v1987_v55 }
 0x164   : > { %v1994_v61 = vadd.f32 %v1230_v56, %v1967_v41  ;;  %v514_v62 = vpop.f32.mrf.mxu0 }
 0x165   : > { %v627_v63 = vmul.f32 0.7978846, %v611_v57  ;;  %v609_v0 = vadd.f32 %v593_v58, %v1975_v46  ;;  %v596_v1 = vmul.f32 0.044715, %v580_v59  ;;  %v578_v2 = vmul.f32 %v562_v60, %v1987_v55 }
 0x166   : > { %v567_v3 = vmul.f32 %v1994_v61, %v1994_v61  ;;  %v2001_v4 = vadd.f32 %v1967_v41, %v514_v62  ;;  %v1231_v5 = vpop.f32.mrf.mxu0 }
 0x167   : > { %1407 = vtanh.f32 %v627_v63  ;;  %v612_v6 = vadd.f32 %v596_v1, %v1981_v50  ;;  %v594_v7 = vmul.f32 0.044715, %v578_v2  ;;  %v2005_v8 = vadd.f32 %v1231_v5, %v1967_v41 }
 0x168   : > { %v583_v9 = vmul.f32 %v567_v3, %v1994_v61  ;;  %v565_v10 = vmul.f32 %v2001_v4, %v2001_v4  ;;  %v517_v11 = vpop.f32.mrf.mxu0  ;;  %v625_v12 = vmul.f32 0.7978846, %v609_v0 }
 0x169   : > { %v628_v13 = vmul.f32 0.7978846, %v612_v6  ;;  %v610_v14 = vadd.f32 %v594_v7, %v1987_v55  ;;  %v568_v15 = vmul.f32 %v2005_v8, %v2005_v8  ;;  %v2014_v16 = vadd.f32 %v1967_v41, %v517_v11 }
 0x16a   : > { %v599_v17 = vmul.f32 0.044715, %v583_v9  ;;  %v581_v18 = vmul.f32 %v565_v10, %v2001_v4  ;;  %v1234_v19 = vpop.f32.mrf.mxu0  ;;  %1409 = vtanh.f32 %v625_v12 }
 0x16b   : > { %1411 = vtanh.f32 %v628_v13  ;;  %v584_v20 = vmul.f32 %v568_v15, %v2005_v8  ;;  %v566_v21 = vmul.f32 %v2014_v16, %v2014_v16  ;;  %v2021_v22 = vadd.f32 %v1234_v19, %v1967_v41 }
 0x16c   : > { %v615_v23 = vadd.f32 %v599_v17, %v1994_v61  ;;  %v597_v24 = vmul.f32 0.044715, %v581_v18  ;;  %v530_v25 = vpop.f32.mrf.mxu0  ;;  %v626_v26 = vmul.f32 0.7978846, %v610_v14 }
 0x16d   : > { %v600_v27 = vmul.f32 0.044715, %v584_v20  ;;  %v582_v28 = vmul.f32 %v566_v21, %v2014_v16  ;;  %v571_v29 = vmul.f32 %v2021_v22, %v2021_v22  ;;  %v2028_v30 = vadd.f32 %v1967_v41, %v530_v25 }
 0x16e   : > { %v631_v31 = vmul.f32 0.7978846, %v615_v23  ;;  %v613_v32 = vadd.f32 %v597_v24, %v2001_v4  ;;  %v1235_v33 = vpop.f32.mrf.mxu0  ;;  %1413 = vtanh.f32 %v626_v26 }
 0x16f   : > { %v616_v34 = vadd.f32 %v600_v27, %v2005_v8  ;;  %v598_v35 = vmul.f32 0.044715, %v582_v28  ;;  %v587_v36 = vmul.f32 %v571_v29, %v2021_v22  ;;  %v569_v37 = vmul.f32 %v2028_v30, %v2028_v30 }
 0x170   : > { %1415 = vtanh.f32 %v631_v31  ;;  %v629_v38 = vmul.f32 0.7978846, %v613_v32  ;;  %v2036_v39 = vadd.f32 %v1235_v33, %v1967_v41  ;;  %v533_v40 = vpop.f32.mrf.mxu0 }
 0x171   : > { %v632_v42 = vmul.f32 0.7978846, %v616_v34  ;;  %v614_v44 = vadd.f32 %v598_v35, %v2014_v16  ;;  %v603_v45 = vmul.f32 0.044715, %v587_v36  ;;  %v585_v47 = vmul.f32 %v569_v37, %v2028_v30 }
 0x172   : > { %1417 = vtanh.f32 %v629_v38  ;;  %v572_v48 = vmul.f32 %v2036_v39, %v2036_v39  ;;  %v2043_v49 = vadd.f32 %v1967_v41, %v533_v40  ;;  %v1238_v51 = vpop.f32.mrf.mxu0 }
 0x173   : > { %1419 = vtanh.f32 %v632_v42  ;;  %v630_v52 = vmul.f32 0.7978846, %v614_v44  ;;  %v619_v53 = vadd.f32 %v603_v45, %v2021_v22  ;;  %v601_v54 = vmul.f32 0.044715, %v585_v47 }
 0x174   : > { %v1408_v56 = vpop.eup %1407  ;;  %v588_v57 = vmul.f32 %v572_v48, %v2036_v39  ;;  %v570_v58 = vmul.f32 %v2043_v49, %v2043_v49  ;;  %v2050_v59 = vadd.f32 %v1238_v51, %v1967_v41  ;;  %v546_v60 = vpop.f32.mrf.mxu0 }
 0x175   : > { %1421 = vtanh.f32 %v630_v52  ;;  %v635_v62 = vmul.f32 0.7978846, %v619_v53  ;;  %v617_v63 = vadd.f32 %v601_v54, %v2028_v30  ;;  %v2054_v0 = vadd.f32 %v1967_v41, %v546_v60 }
 0x176   : > { %v604_v1 = vmul.f32 0.044715, %v588_v57  ;;  %v586_v2 = vmul.f32 %v570_v58, %v2043_v49  ;;  %v575_v3 = vmul.f32 %v2050_v59, %v2050_v59  ;;  %v1239_v5 = vpop.f32.mrf.mxu0  ;;  %v659_v6 = vadd.f32 1.0, %v1408_v56 }
 0x177   : > { %v1410_v7 = vpop.eup %1409  ;;  %1423 = vtanh.f32 %v635_v62  ;;  %v633_v9 = vmul.f32 0.7978846, %v617_v63  ;;  %v573_v10 = vmul.f32 %v2054_v0, %v2054_v0  ;;  %v2062_v11 = vadd.f32 %v1239_v5, %v1967_v41 }
 0x178   : > { %v1412_v12 = vpop.eup %1411  ;;  %v620_v13 = vadd.f32 %v604_v1, %v2036_v39  ;;  %v602_v14 = vmul.f32 0.044715, %v586_v2  ;;  %v591_v15 = vmul.f32 %v575_v3, %v2050_v59  ;;  %v549_v17 = vpop.f32.mrf.mxu0  ;;  %v657_v18 = vadd.f32 1.0, %v1410_v7 }
 0x179   : > { %1425 = vtanh.f32 %v633_v9  ;;  %v589_v19 = vmul.f32 %v573_v10, %v2054_v0  ;;  %v576_v20 = vmul.f32 %v2062_v11, %v2062_v11  ;;  %v2070_v21 = vadd.f32 %v1967_v41, %v549_v17 }
 0x17a   : > { %v636_v23 = vmul.f32 0.7978846, %v620_v13  ;;  %v618_v24 = vadd.f32 %v602_v14, %v2043_v49  ;;  %v607_v25 = vmul.f32 0.044715, %v591_v15  ;;  %v673_v26 = vmul.f32 0.5, %v657_v18 }
 0x17b   : > { %v1414_v27 = vpop.eup %1413  ;;  %v605_v28 = vmul.f32 0.044715, %v589_v19  ;;  %v592_v29 = vmul.f32 %v576_v20, %v2062_v11  ;;  %v574_v31 = vmul.f32 %v2070_v21, %v2070_v21  ;;  %v660_v32 = vadd.f32 1.0, %v1412_v12 }
 0x17c   : > { %1427 = vtanh.f32 %v636_v23  ;;  %v634_v33 = vmul.f32 0.7978846, %v618_v24  ;;  %v623_v34 = vadd.f32 %v607_v25, %v2050_v59  ;;  %v658_v35 = vadd.f32 1.0, %v1414_v27 }
 0x17d   : > { %v1416_v41 = vpop.eup %1415  ;;  %v621_v36 = vadd.f32 %v605_v28, %v2054_v0  ;;  %v608_v37 = vmul.f32 0.044715, %v592_v29  ;;  %v590_v38 = vmul.f32 %v574_v31, %v2070_v21  ;;  %v689_v40 = vmul.f32 %v673_v26, %v1975_v46 }
 0x17e   : > { %1429 = vtanh.f32 %v634_v33  ;;  %v639_v42 = vmul.f32 0.7978846, %v623_v34  ;;  %v674_v44 = vmul.f32 0.5, %v658_v35  ;;  %v675_v45 = vmul.f32 0.5, %v659_v6 }
 0x17f   : > { %v1418_v47 = vpop.eup %1417  ;;  %v637_v48 = vmul.f32 0.7978846, %v621_v36  ;;  %v624_v51 = vadd.f32 %v608_v37, %v2062_v11  ;;  %v606_v52 = vmul.f32 0.044715, %v590_v38  ;;  %v676_v53 = vmul.f32 0.5, %v660_v32 }
 0x180   : > { %v1420_v54 = vpop.eup %1419  ;;  %1431 = vtanh.f32 %v639_v42  ;;  %v690_v56 = vmul.f32 %v674_v44, %v1987_v55  ;;  %v691_v57 = vmul.f32 %v675_v45, %v1970_v43  ;;  %v661_v58 = vadd.f32 1.0, %v1418_v47 }
 0x181   : > { %1433 = vtanh.f32 %v637_v48  ;;  %v640_v60 = vmul.f32 0.7978846, %v624_v51  ;;  %v622_v46 = vadd.f32 %v606_v52, %v2070_v21  ;;  %v692_v62 = vmul.f32 %v676_v53, %v1981_v50 }
 0x182   : > { %v1422_v63 = vpop.eup %1421  ;;  %v721_v1 = vpack.c.bf16 %v690_v56, %v689_v40  ;;  %v677_v2 = vmul.f32 0.5, %v661_v58  ;;  %v663_v3 = vadd.f32 1.0, %v1416_v41  ;;  %v664_v5 = vadd.f32 1.0, %v1420_v54  ;;  %v707_v54 = vld [vmem:[#allocation2 + $0x58] sm:$0xff] }
 0x183   : > { %1435 = vtanh.f32 %v640_v60  ;;  %v638_v6 = vmul.f32 0.7978846, %v622_v46  ;;  %v722_v7 = vpack.c.bf16 %v692_v62, %v691_v57  ;;  %v662_v9 = vadd.f32 1.0, %v1422_v63  ;;  %v705_v57 = vld [vmem:[#allocation2 + $0x30] sm:$0xff]  ;;  %v708_v46 = vld [vmem:[#allocation2 + $0x18] sm:$0xff] }
 0x184   : > { %v1424_v10 = vpop.eup %1423  ;;  %1256 = vmatprep.mubr.bf16.mxu1 %v721_v1  ;;  %v680_v55 = vmul.f32 0.5, %v664_v5  ;;  %v679_v12 = vmul.f32 0.5, %v663_v3  ;;  %v693_v14 = vmul.f32 %v677_v2, %v2001_v4  ;;  %v709_v3 = vld [vmem:[#allocation2 + $0x50] sm:$0xff] }
 0x185   : > { %1437 = vtanh.f32 %v638_v6  ;;  %1257 = vmatmul.mubr.bf16.vlgmr.msra.gmra.mxu1 %v722_v7  ;;  %v678_v43 = vmul.f32 0.5, %v662_v9  ;;  %v667_v23 = vadd.f32 1.0, %v1424_v10  ;;  %v712_v7 = vld [vmem:[#allocation2 + $0x48] sm:$0xff] }
 0x186   : > { %v1426_v13 = vpop.eup %1425  ;;  %v696_v15 = vmul.f32 %v680_v55, %v2005_v8  ;;  %v695_v20 = vmul.f32 %v679_v12, %v1994_v61  ;;  %v710_v55 = vld [vmem:[#allocation2 + $0x68] sm:$0xff] }
 0x187   : > { %v694_v50 = vmul.f32 %v678_v43, %v2014_v16  ;;  %v665_v17 = vadd.f32 1.0, %v1426_v13  ;;  %v683_v4 = vmul.f32 0.5, %v667_v23  ;;  %v715_v13 = vld [vmem:[#allocation2 + $0x10] sm:$0xff] }
 0x188   : > { %v724_v26 = vpack.c.bf16 %v696_v15, %v695_v20  ;;  %v713_v15 = vld [vmem:[#allocation2 + $0x40] sm:$0xff] }
 0x189   : > { %v1428_v18 = vpop.eup %1427  ;;  %v723_v19 = vpack.c.bf16 %v694_v50, %v693_v14  ;;  %v681_v28 = vmul.f32 0.5, %v665_v17  ;;  %v699_v41 = vmul.f32 %v683_v4, %v2021_v22 }
 0x18a   : > { %v668_v24 = vadd.f32 1.0, %v1428_v18 }
 0x18b   : > { %v1430_v25 = vpop.eup %1429  ;;  %1260 = vmatprep.mubr.bf16.mxu1 %v723_v19  ;;  %v697_v35 = vmul.f32 %v681_v28, %v2028_v30  ;;  %v716_v19 = vld [vmem:[#allocation2 + $0x38] sm:$0xff] }
 0x18c   : > { %v666_v27 = vadd.f32 1.0, %v1430_v25  ;;  %v684_v29 = vmul.f32 0.5, %v668_v24  ;;  %v714_v24 = vld [vmem:[#allocation2 + $0x20] sm:$0xff] }
 0x18d   : > { %v1432_v31 = vpop.eup %1431  ;;  %1261 = vmatmul.mubr.bf16.gmra.mxu1 %v724_v26 }
 0x18e   : > { %v1434_v32 = vpop.eup %1433  ;;  %v682_v16 = vmul.f32 0.5, %v666_v27  ;;  %v700_v8 = vmul.f32 %v684_v29, %v2036_v39  ;;  %v671_v36 = vadd.f32 1.0, %v1432_v31  ;;  %v719_v27 = vld [vmem:[#allocation2 + $0x78] sm:$0xff]  ;;  %v717_v31 = vld [vmem:[#allocation2 + $0x60] sm:$0xff] }
 0x18f   : > { %v669_v33 = vadd.f32 1.0, %v1434_v32 }
 0x190   : > { %v1436_v34 = vpop.eup %1435  ;;  %v698_v61 = vmul.f32 %v682_v16, %v2043_v49  ;;  %v726_v42 = vpack.c.bf16 %v700_v8, %v699_v41  ;;  %v687_v39 = vmul.f32 0.5, %v671_v36  ;;  %v720_v16 = vld [vmem:[#allocation2 + $0x28] sm:$0xff] }
 0x191   : > { %v672_v37 = vadd.f32 1.0, %v1436_v34  ;;  %v685_v45 = vmul.f32 0.5, %v669_v33  ;;  %v718_v34 = vld [vmem:[#allocation2 + $0x70] sm:$0xff] }
 0x192   : > { %v1438_v38 = vpop.eup %1437  ;;  %v725_v40 = vpack.c.bf16 %v698_v61, %v697_v35  ;;  %v703_v22 = vmul.f32 %v687_v39, %v2050_v59 }
 0x193   : > { %v670_v44 = vadd.f32 1.0, %v1438_v38  ;;  %v688_v47 = vmul.f32 0.5, %v672_v37  ;;  %v701_v51 = vmul.f32 %v685_v45, %v2054_v0  ;;  %v706_v0 = vld [vmem:[#allocation2] sm:$0xff] }
 0x194   : > { %1264 = vmatprep.mubr.bf16.mxu1 %v725_v40 }
 0x195   : > { %1265 = vmatmul.mubr.bf16.gmra.mxu1 %v726_v42  ;;  %v686_v48 = vmul.f32 0.5, %v670_v44  ;;  %v704_v49 = vmul.f32 %v688_v47, %v2062_v11  ;;  %v711_v11 = vld [vmem:[#allocation2 + $0x8] sm:$0xff] }
 0x197   : > { %v702_v30 = vmul.f32 %v686_v48, %v2070_v21  ;;  %v728_v53 = vpack.c.bf16 %v704_v49, %v703_v22 }
 0x199   : > { %v727_v52 = vpack.c.bf16 %v702_v30, %v701_v51 }
 0x19b   : > { %1268 = vmatprep.mubr.bf16.mxu1 %v727_v52 }
 0x19d   : > { %1269 = vmatmul.mubr.bf16.gmra.mxu1 %v728_v53 }
 0x245   : > { %v1258_v56 = vpop.f32.mrf.mxu1 }
 0x246   : > { %v892_v58 = vadd.f32 %v1258_v56, %v707_v54 }
 0x247   : > { %v827_v60 = vpop.f32.mrf.mxu1 }
 0x248   : > { %908 = vst [vmem:[#allocation2 + $0x58] sm:$0xff] %v892_v58  ;;  %v890_v62 = vadd.f32 %v827_v60, %v705_v57 }
 0x249   : > { %v1259_v63 = vpop.f32.mrf.mxu1 }
 0x24a   : > { %906 = vst [vmem:[#allocation2 + $0x30] sm:$0xff] %v890_v62  ;;  %v893_v21 = vadd.f32 %v1259_v63, %v708_v46 }
 0x24b   : > { %v830_v1 = vpop.f32.mrf.mxu1 }
 0x24c   : > { %909 = vst [vmem:[#allocation2 + $0x18] sm:$0xff] %v893_v21  ;;  %v891_v2 = vadd.f32 %v830_v1, %v706_v0 }
 0x24d   : > { %v1262_v59 = vpop.f32.mrf.mxu1 }
 0x24e   : > { %907 = vst [vmem:[#allocation2] sm:$0xff] %v891_v2  ;;  %v896_v5 = vadd.f32 %v1262_v59, %v711_v11 }
 0x24f   : > { %v843_v6 = vpop.f32.mrf.mxu1 }
 0x250   : > { %912 = vst [vmem:[#allocation2 + $0x8] sm:$0xff] %v896_v5  ;;  %v894_v9 = vadd.f32 %v843_v6, %v709_v3 }
 0x251   : > { %v1263_v10 = vpop.f32.mrf.mxu1 }
 0x252   : > { %910 = vst [vmem:[#allocation2 + $0x50] sm:$0xff] %v894_v9  ;;  %v897_v43 = vadd.f32 %v1263_v10, %v712_v7 }
 0x253   : > { %v846_v12 = vpop.f32.mrf.mxu1 }
 0x254   : > { %913 = vst [vmem:[#allocation2 + $0x48] sm:$0xff] %v897_v43  ;;  %v895_v14 = vadd.f32 %v846_v12, %v710_v55 }
 0x255   : > { %v1266_v50 = vpop.f32.mrf.mxu1 }
 0x256   : > { %911 = vst [vmem:[#allocation2 + $0x68] sm:$0xff] %v895_v14  ;;  %v900_v17 = vadd.f32 %v1266_v50, %v715_v13 }
 0x257   : > { %v859_v18 = vpop.f32.mrf.mxu1 }
 0x258   : > { %916 = vst [vmem:[#allocation2 + $0x10] sm:$0xff] %v900_v17  ;;  %v898_v20 = vadd.f32 %v859_v18, %v713_v15 }
 0x259   : > { %v1267_v23 = vpop.f32.mrf.mxu1 }
 0x25a   : > { %914 = vst [vmem:[#allocation2 + $0x40] sm:$0xff] %v898_v20  ;;  %v901_v25 = vadd.f32 %v1267_v23, %v716_v19 }
 0x25b   : > { %v862_v26 = vpop.f32.mrf.mxu1 }
 0x25c   : > { %917 = vst [vmem:[#allocation2 + $0x38] sm:$0xff] %v901_v25  ;;  %v899_v28 = vadd.f32 %v862_v26, %v714_v24 }
 0x25d   : > { %v1270_v29 = vpop.f32.mrf.mxu1 }
 0x25e   : > { %915 = vst [vmem:[#allocation2 + $0x20] sm:$0xff] %v899_v28  ;;  %v904_v4 = vadd.f32 %v1270_v29, %v719_v27 }
 0x25f   : > { %v875_v32 = vpop.f32.mrf.mxu1 }
 0x260   : > { %920 = vst [vmem:[#allocation2 + $0x78] sm:$0xff] %v904_v4  ;;  %v902_v8 = vadd.f32 %v875_v32, %v717_v31 }
 0x261   : > { %v1271_v33 = vpop.f32.mrf.mxu1 }
 0x262   : > { %918 = vst [vmem:[#allocation2 + $0x60] sm:$0xff] %v902_v8  ;;  %v905_v35 = vadd.f32 %v1271_v33, %v720_v16  ;;  %925 = sbr.rel (%p1166_p1) target bundleno = 626 (0x272), region = 60 }
 0x263   : > { %v878_v61 = vpop.f32.mrf.mxu1 }
 0x264   : > { %921 = vst [vmem:[#allocation2 + $0x28] sm:$0xff] %v905_v35  ;;  %v903_v41 = vadd.f32 %v878_v61, %v718_v34 }
 0x266   : > { %919 = vst [vmem:[#allocation2 + $0x70] sm:$0xff] %v903_v41 }
 0x267   : > { %v926_v36 = vld [vmem:[#allocation2 + $0x30] sm:$0xff]  ;;  %v1167_v37 = vld [vmem:[%s2235_s1] ss:$0 sm:$0xff]  ;;  %v928_v44 = vld [vmem:[#allocation2 + $0x58] sm:$0xff] }
 0x268   : > { %v927_v38 = vld [vmem:[#allocation2] sm:$0xff]  ;;  %v949_v40 = vadd.f32 %v1167_v37, %v926_v36  ;;  %v929_v45 = vld [vmem:[#allocation2 + $0x18] sm:$0xff]  ;;  %v930_v47 = vld [vmem:[#allocation2 + $0x50] sm:$0xff]  ;;  %v951_v48 = vadd.f32 %v1167_v37, %v928_v44 }
 0x269   : > { %v950_v42 = vadd.f32 %v1167_v37, %v927_v38  ;;  %v952_v39 = vadd.f32 %v1167_v37, %v929_v45  ;;  %v953_v51 = vadd.f32 %v1167_v37, %v930_v47  ;;  %v931_v30 = vld [vmem:[#allocation2 + $0x68] sm:$0xff]  ;;  %v934_v56 = vld [vmem:[#allocation2 + $0x40] sm:$0xff]  ;;  %v936_v58 = vld [vmem:[#allocation2 + $0x10] sm:$0xff] }
 0x26a   : > { %v932_v49 = vld [vmem:[#allocation2 + $0x8] sm:$0xff]  ;;  %965 = vst [vmem:[%s1927_s11] sm:$0xff] %v949_v40  ;;  %v954_v22 = vadd.f32 %v1167_v37, %v931_v30  ;;  %v935_v57 = vld [vmem:[#allocation2 + $0x20] sm:$0xff]  ;;  %967 = vst [vmem:[%s1927_s11 + $0x10] sm:$0xff] %v951_v48  ;;  %v957_v60 = vadd.f32 %v1167_v37, %v934_v56  ;;  %v959_v62 = vadd.f32 %v1167_v37, %v936_v58 }
 0x26b   : > { %v933_v52 = vld [vmem:[#allocation2 + $0x48] sm:$0xff]  ;;  %966 = vst [vmem:[%s1927_s11 + $0x8] sm:$0xff] %v950_v42  ;;  %v955_v53 = vadd.f32 %v1167_v37, %v932_v49  ;;  %968 = vst [vmem:[%s1927_s11 + $0x18] sm:$0xff] %v952_v39  ;;  %v958_v46 = vadd.f32 %v1167_v37, %v935_v57  ;;  %v937_v63 = vld [vmem:[#allocation2 + $0x38] sm:$0xff] }
 0x26c   : > { %v956_v54 = vadd.f32 %v1167_v37, %v933_v52  ;;  %969 = vst [vmem:[%s1927_s11 + $0x20] sm:$0xff] %v953_v51  ;;  %v938_v0 = vld [vmem:[#allocation2 + $0x60] sm:$0xff]  ;;  %970 = vst [vmem:[%s1927_s11 + $0x28] sm:$0xff] %v954_v22  ;;  %v960_v1 = vadd.f32 %v1167_v37, %v937_v63  ;;  %v940_v59 = vld [vmem:[#allocation2 + $0x78] sm:$0xff] }
 0x26d   : > { %v939_v21 = vld [vmem:[#allocation2 + $0x70] sm:$0xff]  ;;  %971 = vst [vmem:[%s1927_s11 + $0x30] sm:$0xff] %v955_v53  ;;  %v961_v11 = vadd.f32 %v1167_v37, %v938_v0  ;;  %v941_v3 = vld [vmem:[#allocation2 + $0x28] sm:$0xff]  ;;  %973 = vst [vmem:[%s1927_s11 + $0x40] sm:$0xff] %v957_v60  ;;  %v963_v5 = vadd.f32 %v1167_v37, %v940_v59 }
 0x26e   : > { %972 = vst [vmem:[%s1927_s11 + $0x38] sm:$0xff] %v956_v54  ;;  %v962_v2 = vadd.f32 %v1167_v37, %v939_v21  ;;  %974 = vst [vmem:[%s1927_s11 + $0x48] sm:$0xff] %v958_v46  ;;  %v964_v6 = vadd.f32 %v1167_v37, %v941_v3 }
 0x26f   : > { %975 = vst [vmem:[%s1927_s11 + $0x50] sm:$0xff] %v959_v62  ;;  %976 = vst [vmem:[%s1927_s11 + $0x58] sm:$0xff] %v960_v1 }
 0x270   : > { %977 = vst [vmem:[%s1927_s11 + $0x60] sm:$0xff] %v961_v11  ;;  %978 = vst [vmem:[%s1927_s11 + $0x68] sm:$0xff] %v962_v2 }
 0x271   : > { %979 = vst [vmem:[%s1927_s11 + $0x70] sm:$0xff] %v963_v5  ;;  %980 = vst [vmem:[%s1927_s11 + $0x78] sm:$0xff] %v964_v6 }
 0x272 PF: > { %s2236_s24 = sld [smem:[#allocation15_spill]]  ;;  %s995_s6 = sshll.u32 %s1927_s11, 4  ;;  %s2124_s6 = int_to_ptr.vmem [resolvable:$true] %s995_s6 }
 0x273   : > { %s2238_s13 = sld [smem:[#allocation25_spill]]  ;;  %s982_s17 = scalar_lea.sflag [#allocation5], %s1899_s7 }
 0x274   : > { %s1523_s25 = scalar_lea.vmem %s2124_s6, 2048  ;;  %s1657_s5 = smov [#allocation9]  }
 0x275   : > { %p1524_p10 = scmp.ne.s32.totalorder %s2124_s6, %s1523_s25  ;;  %s1527_s14 = sshll.u32 %s1657_s5, 4  ;;  %s1528_s14 = int_to_ptr.vmem [resolvable:$false] %s1527_s14 }
 0x276   : > { %s1529_s30 = scalar_lea.vmem %s1528_s14, 4096  ;;  %p1530_p8 = scmp.lt.s32.totalorder %s2124_s6, %s1528_s14 }
 0x277   : > { %p1525_p3 = pnand %p1524_p10, %p1849_p0  ;;  %p1531_p9 = scmp.lt.s32.totalorder %s1529_s30, %s1523_s25 }
 0x278   : > { %s1175_s0 = sshll.u32 %s2236_s24, 11 }
 0x279   : > { %s2121_s29 = scalar_lea.hbm %s2238_s13, %s1175_s0  ;;  %p1526_p5 = pneg %p1525_p3 }
 0x27a   : > { %p1532_p13 = por %p1531_p9, %p1530_p8 }
 0x27c   : > { %p1533_p2 = pnand %p1532_p13, %p1526_p5 }
 0x27e   : > { %1536 = shalt.err (!%p1533_p2)
}
 0x27f   : > { %s1537_s18 = scalar_lea.hbm %s2121_s29, 2048  ;;  %s1541_s11 = scalar_lea.hbm %s2238_s13, 4096 }
 0x280   : > { %p1538_p12 = scmp.ne.s32.totalorder %s2121_s29, %s1537_s18  ;;  %p1542_p7 = scmp.lt.s32.totalorder %s2121_s29, %s2238_s13 }
 0x281   : > { %p1543_p11 = scmp.lt.s32.totalorder %s1541_s11, %s1537_s18 }
 0x282   : > { %p1539_p6 = pnand %p1538_p12, %p1849_p0 }
 0x283   : > { %p1544_p1 = por %p1543_p11, %p1542_p7 }
 0x284   : > { %p1540_p4 = pneg %p1539_p6 }
 0x286   : > { %p1545_p10 = pnand %p1544_p1, %p1540_p4 }
 0x288   : > { %1548 = shalt.err (!%p1545_p10)
}
 0x289   : > { %s1658_s27 = smov 128   ;;  %s1659_s15 = smov 8  }
 0x28a   : > { %1278 = dma.vmem_to_hbm [thread:$0]  (%p1849_p0), %s2124_s6, 2048, %s2121_s29, %s982_s17, %s1658_s27, %s1658_s27, %s1659_s15  }
 0x28b PF: > { %p1295_p3 = scmp.ge.s32.totalorder %s1647_s28, 2  ;;  %s1010_s1 = sand.u32 1, %s1619_s21  }
 0x28c   : > { %p2239_p5 = scmp.ne.s32.totalorder %s2227_s20, 0  ;;  %s1011_s24 = scalar_lea.sflag [#allocation5], %s1010_s1 }
 0x28e   : > { %p1291_p8 = pnand %p1295_p3, %p2239_p5 }
 0x290   : > { %p1292_p9 = pneg %p1291_p8 }
 0x292   : > { %1602 = dma.done.wait (%p1292_p9), %s1011_s24, 2048  }
 0x293   : > { %1604 = vsyncadd (%p1292_p9), %s1011_s24, 4294965248  ;;  %s24_s28 = sadd.s32 1, %s1647_s28   ;;  %s2240_s0 = sld [smem:[#allocation13_spill]] }
 0x294   : > { %p21_p13 = scmp.ge.s32.totalorder %s24_s28, 6   ;;  %s2241_s20 = sld [smem:[#allocation18_spill]] }
 0x295   : > { %s2242_s7 = sld [smem:[#allocation14_spill]]  ;;  %s2247_s18 = smov %s1611_s19 }
 0x296   : > { %s2243_s23 = sld [smem:[#allocation21_spill]]  ;;  %s2249_s21 = smov %s1623_s22 }
 0x297   : > { %s2244_s25 = sld [smem:[#allocation16_spill]]  ;;  %s2251_s24 = smov %s1639_s26 }
 0x298   : > { %s2245_s12 = sld [smem:[#allocation17_spill]] }
 0x299   : > { %s2246_s27 = sld [smem:[#allocation19_spill]]  ;;  %s2248_s19 = smov %s2240_s0 }
 0x29a   :  { %23 = sbr.rel (!%p21_p13) target bundleno = 16 (0x10), region = 120 }
 0x29b   : > { %s2250_s22 = smov %s2242_s7 }
 0x29e   : > { %s2252_s26 = smov %s2245_s12 }
 0x29f   :  { %1016 = vsyncpa [#allocation4], 1 }
 0x2a0   :  { %1018 = vsyncpa [#allocation4 + $0x1], 1 }
 0x2a1   :  { %1019 = vsyncpa [#allocation7], 1 }
 0x2a2   :  { %1021 = vsyncpa [#allocation7 + $0x1], 1 }
 0x2a3   :  { %1022 = vsyncpa [#allocation5], 1 }
 0x2a4   :  { %1024 = vsyncpa [#allocation5 + $0x1], 1 }

</bundles_post_ra>
